<compile_context>
chip_gen: v7x
topology: tpu7x:2x2x1
jax: 0.10.0
libtpu: 0.0.40
codegen_flags: <defaults>
</compile_context>

<pallas_src>
import jax
import jax.numpy as jnp
from jax.experimental import pallas as pl
from jax.experimental.pallas import tpu as pltpu


_MIN_PALLAS_ELEMS = 8192              # below this, XLA's fused elementwise wins
_TARGET_TILE_BYTES = 4 * 1024 * 1024  # ~4 MiB per operand tile
_MIN_GRID_STEPS = 4                   # keep grid long enough for 2 TCs (v7x)


def _round_up(x, m):
    return (x + m - 1) // m * m


def _scale_kernel(s_ref, x_ref, o_ref):
    # s_ref: (1,) f32 folded scale (w - 1) in SMEM
    # x_ref / o_ref: (tile_rows, cols) lane-dense tile in native dtype in VMEM
    # Body: one vmul per vreg (f32 in-vreg), cast back to the native dtype.
    o_ref[...] = (x_ref[...].astype(jnp.float32) * s_ref[0]).astype(o_ref.dtype)


def conv1x1_sub(x, weight):
    """Forward of the module: conv1x1(x) - x == (w - 1) * x.

    x: float array (Conv1d expects (N, 1, L)); weight: Conv1d weight (1, 1, 1).
    """
    orig_shape = x.shape
    dtype = x.dtype
    total = x.size
    itemsize = jnp.dtype(dtype).itemsize

    # Fold (w - 1) into one f32 scalar on the host side.
    scale = jnp.asarray(weight, jnp.float32).reshape(1) - jnp.float32(1.0)

    # Fast path: tiny or lane-ragged inputs. XLA's fused elementwise op is
    # already at the HBM roofline and avoids any pad copy / launch overhead.
    if total < _MIN_PALLAS_ELEMS or total % 128 != 0:
        return (x.astype(jnp.float32) * scale[0]).astype(dtype)

    # Lane-dense 2D view with zero padding cost: widest cols that divides.
    if total % 512 == 0:
        cols = 512
    elif total % 256 == 0:
        cols = 256
    else:
        cols = 128
    rows = total // cols

    # Block rows: multiple of the sublane packing for this dtype, ~4 MiB per
    # tile, capped so the grid has at least _MIN_GRID_STEPS steps.
    sub = max(8, 32 // itemsize)  # 8 for f32, 16 for bf16, 32 for int8/fp8
    tile_rows = max(sub, (_TARGET_TILE_BYTES // (cols * itemsize)) // sub * sub)
    tile_rows = min(tile_rows, _round_up(pl.cdiv(rows, _MIN_GRID_STEPS), sub))
    tile_rows = max(tile_rows, sub)

    grid = (pl.cdiv(rows, tile_rows),)  # block need not divide rows: Pallas
                                        # handles the partial final block.

    tile_bytes = tile_rows * cols * itemsize
    # Cover 2 buffers x (in + out) of the tile, plus headroom; fits v5e's
    # scoped VMEM (explicitly raised) and v7x's 64 MiB physical VMEM.
    vmem_limit = max(32 * 1024 * 1024, 4 * tile_bytes + 4 * 1024 * 1024)

    x2d = jnp.ravel(x).reshape(rows, cols)   # metadata-only view, no copy

    out2d = pl.pallas_call(
        _scale_kernel,
        out_shape=jax.ShapeDtypeStruct((rows, cols), dtype),
        grid=grid,
        in_specs=[
            pl.BlockSpec(memory_space=pltpu.MemorySpace.SMEM),   # folded (w - 1)
            pl.BlockSpec((tile_rows, cols), lambda i: (i, 0)),   # lane-dense x tile
        ],
        out_specs=pl.BlockSpec((tile_rows, cols), lambda i: (i, 0)),
        compiler_params=pltpu.CompilerParams(
            dimension_semantics=("parallel",),   # shard tiles across TCs (v7x)
            vmem_limit_bytes=int(vmem_limit),
        ),
        cost_estimate=pl.CostEstimate(
            flops=total,
            transcendentals=0,
            bytes_accessed=2 * total * itemsize,
        ),
    )(scale, x2d)

    return out2d.reshape(orig_shape)


if __name__ == "__main__":
    key = jax.random.PRNGKey(0)
    kx1, kx2, kx3, kw = jax.random.split(key, 4)

    # Deterministic Conv1d weight, shape (out=1, in=1, k=1) -> a single scalar.
    weight = jax.random.uniform(kw, (1, 1, 1), dtype=jnp.float32,
                                minval=-1.0, maxval=1.0)
    w_scalar = weight[0, 0, 0]

    # 1) Pallas path: (8, 1, 2048) -> 16384 elems, 4 grid steps of (8, 512).
    x_big = jax.random.normal(kx1, (8, 1, 2048), dtype=jnp.float32)
    out_big = jax.block_until_ready(conv1x1_sub(x_big, weight))
    ref_big = w_scalar * x_big - x_big
    assert out_big.shape == x_big.shape
    assert jnp.allclose(out_big, ref_big, atol=1e-5, rtol=1e-5)

    # 2) Pallas path with a partial final block: rows=40, tile_rows=16 -> 3 steps.
    x_part = jax.random.normal(kx2, (10, 1, 2048), dtype=jnp.float32)
    out_part = jax.block_until_ready(conv1x1_sub(x_part, weight))
    ref_part = w_scalar * x_part - x_part
    assert out_part.shape == x_part.shape
    assert jnp.allclose(out_part, ref_part, atol=1e-5, rtol=1e-5)

    # 3) Small-input fast path (Conv1d-shaped tiny case, like the spec's input).
    x_small = jax.random.normal(kx3, (2, 1, 128), dtype=jnp.float32)
    out_small = jax.block_until_ready(conv1x1_sub(x_small, weight))
    ref_small = w_scalar * x_small - x_small
    assert out_small.shape == x_small.shape
    assert jnp.allclose(out_small, ref_small, atol=1e-5, rtol=1e-5)

    print("KERNEL_OK")
</pallas_src>

<mosaic_0001>
module attributes {stable_mosaic.version = 11 : i64} {
  func.func @_scale_kernel(%arg0: i32, %arg1: memref<1xf32, #tpu.memory_space<smem>>, %arg2: memref<8x512xf32, #tpu.memory_space<vmem>>, %arg3: memref<8x512xf32, #tpu.memory_space<vmem>>) attributes {dimension_semantics = [#tpu.dimension_semantics<parallel>], iteration_bounds = array<i64: 4>, scalar_prefetch = 0 : i64, scratch_operands = 0 : i64, tpu.core_type = #tpu.core_type<tc>, window_params = [{transform_indices = @transform_0, window_bounds = array<i64: 1>}, {transform_indices = @transform_1, window_bounds = array<i64: 8, 512>}, {transform_indices = @transform_2, window_bounds = array<i64: 8, 512>}]} {
    %c0 = arith.constant 0 : index
    %c0_0 = arith.constant 0 : index
    %0 = vector.load %arg2[%c0, %c0_0] : memref<8x512xf32, #tpu.memory_space<vmem>>, vector<8x512xf32>
    %c0_1 = arith.constant 0 : index
    %1 = memref.load %arg1[%c0_1] : memref<1xf32, #tpu.memory_space<smem>>
    %2 = vector.broadcast %1 : f32 to vector<8x512xf32>
    %3 = arith.mulf %0, %2 : vector<8x512xf32>
    %c0_2 = arith.constant 0 : index
    %c0_3 = arith.constant 0 : index
    %4 = vector.load %arg3[%c0_2, %c0_3] : memref<8x512xf32, #tpu.memory_space<vmem>>, vector<8x512xf32>
    tpu.vector_store %arg3[%c0_2, %c0_3], %3 {strides = array<i32>} : memref<8x512xf32, #tpu.memory_space<vmem>>, vector<8x512xf32>,
    return
  }
  func.func @transform_0(%arg0: i32) -> i32 {
    %c0_i32 = arith.constant 0 : i32
    %c0_i32_0 = arith.constant 0 : i32
    return %c0_i32 : i32
  }
  func.func @transform_1(%arg0: i32) -> (i32, i32) {
    %c0_i32 = arith.constant 0 : i32
    %c0_i32_0 = arith.constant 0 : i32
    return %arg0, %c0_i32 : i32, i32
  }
  func.func @transform_2(%arg0: i32) -> (i32, i32) {
    %c0_i32 = arith.constant 0 : i32
    %c0_i32_0 = arith.constant 0 : i32
    return %arg0, %c0_i32 : i32, i32
  }
}

</mosaic_0001>

<bundles_post_ra>
// kernel: tpu_custom_call.1
= control target key start
LH: loop header
LB: loop body
LE: loop exit
PB: predicated region body
PF: predicated region fallthrough
CT: control target
= control target key end

     0   :  { %s599_s0 = inlined_call_operand.<no memory space> [shape: f32[1], index: 0, kind: input, shape index: {}]   ;;  %s600_s1 = inlined_call_operand.hbm [shape: f32[32,512], index: 1, kind: input, shape index: {}]   ;;  %s601_s2 = inlined_call_operand.hbm [shape: f32[32,512], index: 2, kind: output, shape index: {}]  }
   0x1   :  { %7 = sst [smem:[#allocation2]] %s599_s0 }
   0x2   :  { %8 = vsyncpa [#allocation4], 0 }
   0x3   :  { %10 = vsyncpa [#allocation4 + $0x1], 0 }
   0x4   :  { %11 = vsyncpa [#allocation5], 0 }
   0x5   :  { %13 = vsyncpa [#allocation5 + $0x1], 0  ;;  %s440_s11 = smov 0   ;;  %s442_s12 = smov 0  }
   0x6   :  { %s444_s13 = smov 0   ;;  %s446_s14 = smov 0  }
   0x7 LB: > { %s461_s0 = sadd.s32 4294967295, %s418_s14   ;;  %s260_s15 = sadd.s32 4294967294, %s418_s14   ;;  %s418_s14 = sphi %s446_s14, %s615_s14   ;;  %s414_s13 = sphi %s444_s13, %s614_s13   ;;  %s410_s12 = sphi %s442_s12, %s613_s12   ;;  %s406_s11 = sphi %s440_s11, %s612_s11  }
   0x8   : > { %s465_s16 = sadd.s32 1, %s418_s14   ;;  %s47_s17 = sadd.s32 1, %s414_s13 }
   0x9   : > { %s44_s18 = ssub.s32 %s418_s14, %s465_s16  ;;  %p54_p0 = scmp.ne.s32.totalorder %s414_s13, %s410_s12 }
   0xa   : > { %p45_p1 = scmp.eq.s32.totalorder %s44_s18, 0  ;;  %p55_p2 = scmp.eq.s32.totalorder %s418_s14, 0 }
   0xb   : > { %p60_p3 = scmp.ne.s32.totalorder %s410_s12, %s406_s11  ;;  %p61_p4 = scmp.eq.s32.totalorder %s461_s0, 0 }
   0xc   : > { %s477_s19 = scalar_select %p45_p1, %s414_s13, %s47_s17  }
   0xd   : > { %p479_p5 = por %p55_p2, %p54_p0  ;;  %p483_p6 = por %p61_p4, %p60_p3 }
   0xe   : > { %p84_p7 = scmp.eq.s32.totalorder %s461_s0, 3  ;;  %p90_p8 = scmp.eq.s32.totalorder %s260_s15, 3 }
   0xf   : > { %p288_p9 = scmp.lt.s32.totalorder %s418_s14, 4  ;;  %s113_s24 = sand.u32 1, %s414_s13  }
  0x10   : > { %p489_p10 = por %p84_p7, %p54_p0  ;;  %p493_p11 = por %p90_p8, %p60_p3 }
  0x11   : > { %s274_s25 = sshll.u32 %s418_s14, 9  ;;  %s263_s26 = sshll.u32 %s113_s24, 5 }
  0x12   : > { %s605_s22 = scalar_select %p489_p10, 1, 0 }
  0x13   : > { %s606_s23 = scalar_select %p493_p11, 1, 0 }
  0x14   : > { %s502_s29 = scalar_lea.hbm %s600_s1, %s274_s25  ;;  %s117_s30 = scalar_lea.vmem [#allocation3], %s263_s26 }
  0x15   : > { %s125_s3 = sshll.u32 %s117_s30, 4  ;;  %p506_p12 = pnand %p288_p9, %p479_p5  ;;  %s510_s3 = int_to_ptr.vmem [resolvable:$true] %s125_s3 }
  0x16   : > { %s114_s5 = scalar_lea.sflag [#allocation4], %s113_s24  ;;  %s322_s6 = scalar_lea.hbm %s502_s29, 512 }
  0x17   : > { %p323_p1 = scmp.ne.s32.totalorder %s502_s29, %s322_s6  ;;  %p324_p2 = pneg %p506_p12 }
  0x18   : > { %s327_s9 = scalar_lea.hbm %s600_s1, 2048  ;;  %p328_p5 = scmp.lt.u32.totalorder %s502_s29, %s600_s1 }
  0x19   : > { %p325_p3 = pnand %p324_p2, %p323_p1  ;;  %p329_p7 = scmp.lt.u32.totalorder %s327_s9, %s322_s6 }
  0x1a   : > { %p331_p9 = scmp.lt.u32.totalorder %s322_s6, %s502_s29 }
  0x1b   : > { %p326_p4 = pneg %p325_p3  ;;  %p330_p8 = por %p329_p7, %p328_p5 }
  0x1d   : > { %p332_p13 = por %p331_p9, %p330_p8 }
  0x1f   : > { %p333_p0 = pnand %p332_p13, %p326_p4 }
  0x21   : > { %336 = shalt.err (!%p333_p0)
}
  0x22   : > { %s337_s17 = scalar_lea.vmem %s510_s3, 512  ;;  %s420_s18 = smov [#allocation3]  }
  0x23   : > { %p338_p1 = scmp.ne.s32.totalorder %s510_s3, %s337_s17  ;;  %s342_s20 = sshll.u32 %s420_s18, 4  ;;  %s343_s20 = int_to_ptr.vmem [resolvable:$false] %s342_s20 }
  0x24   : > { %s344_s24 = scalar_lea.vmem %s343_s20, 1024  ;;  %p345_p10 = scmp.lt.s32.totalorder %s510_s3, %s343_s20 }
  0x25   : > { %p340_p3 = pnand %p338_p1, %p324_p2  ;;  %p346_p5 = scmp.lt.s32.totalorder %s344_s24, %s337_s17 }
  0x27   : > { %p341_p11 = pneg %p340_p3  ;;  %p347_p7 = por %p346_p5, %p345_p10 }
  0x29   : > { %p348_p8 = pnand %p347_p7, %p341_p11 }
  0x2b   : > { %351 = shalt.err (!%p348_p8)
}
  0x2c   : > { %283 = dma.hbm_to_vmem [thread:$0]  (!%p506_p12), %s502_s29, 512, %s510_s3, %s114_s5  }
  0x2d   : > { %p608_p13 = scmp.lt.s32.totalorder %s418_s14, 5  ;;  %p609_p0 = scmp.ge.s32.totalorder %s418_s14, 1 }
  0x2f   : > { %p131_p2 = pnand %p609_p0, %p608_p13 }
  0x30   : > { %s544_s25 = sand.u32 (!%p131_p2), 1, %s410_s12  }
  0x31   : > { %134 = sbr.rel (%p131_p2) target bundleno = 83 (0x53), region = 28  ;;  %s267_s26 = sshll.u32 (!%p131_p2), %s544_s25, 5 }
  0x32   : > { %s137_s27 = scalar_lea.sflag (!%p131_p2), [#allocation4], %s544_s25  ;;  %s140_s28 = scalar_lea.vmem (!%p131_p2), [#allocation3], %s267_s26 }
  0x38   : > { %397 = dma.done.wait (%p483_p6), %s137_s27, 512  }
  0x39   : > { %399 = vsyncadd (%p483_p6), %s137_s27, 4294966784  ;;  %s165_s29 = sld [smem:[#allocation2]]  ;;  %s160_s30 = scalar_lea.vmem [#allocation6], %s267_s26  ;;  %v161_v0 = vld [vmem:[%s140_s28] sm:$0xff]  ;;  %v162_v2 = vld [vmem:[%s140_s28 + $0x8] sm:$0xff] }
  0x3a   : > { %s190_s3 = sshll.u32 %s160_s30, 4  ;;  %s275_s4 = sshll.u32 %s461_s0, 9  ;;  %v163_v3 = vld [vmem:[%s140_s28 + $0x10] sm:$0xff]  ;;  %v164_v7 = vld [vmem:[%s140_s28 + $0x18] sm:$0xff]  ;;  %s553_s3 = int_to_ptr.vmem [resolvable:$true] %s190_s3 }
  0x3b   : > { %s558_s0 = scalar_lea.hbm %s601_s2, %s275_s4  ;;  %s176_s6 = scalar_lea.sflag [#allocation5], %s544_s25 }
  0x3c   : > { %s352_s7 = scalar_lea.vmem %s553_s3, 512  ;;  %p610_p10 = scmp.ne.s32.totalorder %s605_s22, 0 }
  0x3d   : > { %p353_p6 = scmp.ne.s32.totalorder %s553_s3, %s352_s7  ;;  %s421_s8 = smov [#allocation6]  }
  0x3e   : > { %s356_s9 = sshll.u32 %s421_s8, 4  ;;  %s357_s9 = int_to_ptr.vmem [resolvable:$false] %s356_s9 }
  0x3f   : > { %v166_v1 = vstv %s165_s29  ;;  %p354_p11 = pnand %p353_p6, %p610_p10  ;;  %s358_s10 = scalar_lea.vmem %s357_s9, 1024 }
  0x40   : > { %v167_v4 = vmul.f32 %v166_v1, %v161_v0  ;;  %v168_v5 = vmul.f32 %v166_v1, %v162_v2  ;;  %v169_v6 = vmul.f32 %v166_v1, %v163_v3  ;;  %v170_v8 = vmul.f32 %v166_v1, %v164_v7  ;;  %p359_p4 = scmp.lt.s32.totalorder %s553_s3, %s357_s9  ;;  %p360_p9 = scmp.lt.s32.totalorder %s358_s10, %s352_s7 }
  0x41   : > { %p355_p12 = pneg %p354_p11 }
  0x42   : > { %171 = vst [vmem:[%s160_s30] sm:$0xff] %v167_v4  ;;  %172 = vst [vmem:[%s160_s30 + $0x8] sm:$0xff] %v168_v5  ;;  %p361_p1 = por %p360_p9, %p359_p4 }
  0x43   : > { %173 = vst [vmem:[%s160_s30 + $0x10] sm:$0xff] %v169_v6  ;;  %174 = vst [vmem:[%s160_s30 + $0x18] sm:$0xff] %v170_v8 }
  0x44   : > { %p362_p3 = pnand %p361_p1, %p355_p12 }
  0x46   : > { %365 = shalt.err (!%p362_p3)
}
  0x47   : > { %s366_s15 = scalar_lea.hbm %s558_s0, 512  ;;  %s370_s20 = scalar_lea.hbm %s601_s2, 2048 }
  0x48   : > { %p367_p5 = scmp.ne.s32.totalorder %s558_s0, %s366_s15  ;;  %p371_p13 = scmp.lt.u32.totalorder %s558_s0, %s601_s2 }
  0x49   : > { %p372_p0 = scmp.lt.u32.totalorder %s370_s20, %s366_s15  ;;  %p374_p6 = scmp.lt.u32.totalorder %s366_s15, %s558_s0 }
  0x4a   : > { %p368_p7 = pnand %p367_p5, %p610_p10 }
  0x4b   : > { %p373_p2 = por %p372_p0, %p371_p13 }
  0x4c   : > { %p369_p8 = pneg %p368_p7 }
  0x4d   : > { %p375_p11 = por %p374_p6, %p373_p2 }
  0x4f   : > { %p376_p12 = pnand %p375_p11, %p369_p8 }
  0x51   : > { %379 = shalt.err (!%p376_p12)
}
  0x52   : > { %278 = dma.vmem_to_hbm [thread:$0]  (%p610_p10), %s553_s3, 512, %s558_s0, %s176_s6  }
  0x53 PF: > { %p289_p4 = scmp.ge.s32.totalorder %s418_s14, 2  ;;  %s202_s26 = sand.u32 1, %s406_s11  }
  0x54   : > { %p611_p9 = scmp.ne.s32.totalorder %s606_s23, 0  ;;  %s203_s27 = scalar_lea.sflag [#allocation5], %s202_s26 }
  0x56   : > { %p285_p1 = pnand %p289_p4, %p611_p9 }
  0x58   : > { %401 = dma.done.wait (!%p285_p1), %s203_s27, 512  }
  0x59   : > { %403 = vsyncadd (!%p285_p1), %s203_s27, 4294966784  ;;  %p16_p3 = scmp.ge.s32.totalorder %s465_s16, 6   ;;  %s612_s11 = smov %s410_s12 }
  0x5a   : > { %s613_s12 = smov %s414_s13  ;;  %s614_s13 = smov %s477_s19 }
  0x5b   : > { %s615_s14 = smov %s465_s16  ;;  %18 = sbr.rel (!%p16_p3) target bundleno = 7 (0x7), region = 73 }
  0x62   :  { %208 = vsyncpa [#allocation4], 1 }
  0x63   :  { %210 = vsyncpa [#allocation4 + $0x1], 1 }
  0x64   :  { %211 = vsyncpa [#allocation5], 1 }
  0x65   :  { %213 = vsyncpa [#allocation5 + $0x1], 1 }

</bundles_post_ra>
